<compile_context>
chip_gen: v7x
topology: tpu7x:2x2x1
jax: 0.10.0
libtpu: 0.0.40
codegen_flags: <defaults>
</compile_context>

<pallas_src>
import jax
import jax.numpy as jnp
from jax.experimental import pallas as pl
from jax.experimental.pallas import tpu as pltpu


def convnet_kernel(x_ref, w1_ref, b1_ref, t1p_ref,
                   w2_ref, b2_ref,
                   wf1_ref, bf1_ref, wf2_ref, bf2_ref,
                   out_ref):
    bb, Lx, _ = x_ref.shape            # Lx = L + 4 (2 extra conv1 rows per side, see wrapper)
    L = Lx - 4
    C1 = w1_ref.shape[-1]              # 32
    C2 = w2_ref.shape[-1]              # 64
    L2, L4 = L // 2, L // 4
    Lp = L2 + 2                        # pooled length incl. 1 zero row each side
    bf16, f32 = jnp.bfloat16, jnp.float32

    # ---------- Conv1d(Cin,32,k=3,pad=1): ONE MXU matmul over the glue-built im2col slab ----------
    h = jnp.einsum('blc,co->blo', x_ref[...], w1_ref[...],
                   preferred_element_type=f32)             # (bb, L+4, 32), f32 accumulate
    h = jnp.maximum(h + b1_ref[...], 0.0)                  # bias + ReLU (f32)
    h = jnp.max(h.reshape(bb, Lp, 2, C1), axis=2)          # MaxPool1d(2) over the extended length
    h = h + t1p_ref[...]                                   # BN1 shift (scale folded into w2)
    # Zero the two junk edge rows -> they become conv2's zero padding (in registers, no stores).
    row = jax.lax.broadcasted_iota(jnp.int32, (bb, Lp, C1), 1)
    hb = jnp.where((row == 0) | (row == Lp - 1), 0.0, h).astype(bf16)   # (bb, L2+2, 32)

    # ---------- Conv1d(32,64,k=3,pad=1): im2col = 3 shifted value slices + lane concat ----------
    slab2 = jnp.concatenate([hb[:, 0:L2, :],               # tap k=0 : hb[l-1]
                             hb[:, 1:L2 + 1, :],           # tap k=1 : hb[l]
                             hb[:, 2:L2 + 2, :]],          # tap k=2 : hb[l+1]
                            axis=-1)                       # (bb, L2, 96) bf16, in registers
    g = jnp.einsum('blc,co->blo', slab2, w2_ref[...],
                   preferred_element_type=f32)             # (bb, L/2, 64)
    g = jnp.maximum(g + b2_ref[...], 0.0)                  # bias + ReLU
    g = jnp.max(g.reshape(bb, L4, 2, C2), axis=2)          # MaxPool1d(2); BN2 folded into FC1
    g = g.astype(bf16)

    # ---------- Flatten + Linear(64*L4, 128): lane-axis concat (no scratch) + ONE matmul ----------
    # PyTorch's channel-major flatten order is absorbed by the wf1 permutation in glue.
    # TODO(synk): stream wf1 over a reduction grid axis for very long sequences (v7x VMEM).
    gflat = jnp.concatenate([g[:, l, :] for l in range(L4)], axis=-1)   # (bb, L4*64) bf16
    z = jnp.dot(gflat, wf1_ref[...], preferred_element_type=f32) + bf1_ref[...]
    z = jnp.maximum(z, 0.0)                                # ReLU
    # Dropout(0.5): identity at inference.

    # ---------- Linear(128, out): out padded to 128 lanes in glue -> unmasked stores ----------
    out = jnp.dot(z.astype(bf16), wf2_ref[...], preferred_element_type=f32) + bf2_ref[...]
    out_ref[...] = out.astype(out_ref.dtype)


def _pick_batch_block(B, per_row_bytes, budget_bytes, max_bb=256):
    cap = max(1, min(max_bb, budget_bytes // max(per_row_bytes, 1)))
    divisors = [d for d in range(1, B + 1) if B % d == 0 and d <= cap]
    if B >= 16:  # keep >= 2 grid steps so v7x's two TensorCores both get work
        two_step = [d for d in divisors if B // d >= 2]
        if two_step:
            divisors = two_step
    return max(divisors) if divisors else 1


def convnet_forward(x_nlc, kp):
    B, L, Cin = x_nlc.shape
    assert L % 4 == 0, "wrapper assumes seq length divisible by 4"
    L2, L4 = L // 2, L // 4
    Lx = L + 4
    out_ch = kp['wf2'].shape[-1]
    out_pad = ((out_ch + 127) // 128) * 128                # lane-dense output width

    # --- glue: conv1 im2col (zero padding included), bf16; 2 extra rows/side feed the
    #     pooled zero-pad trick used for conv2's in-register im2col ---
    xp3 = jnp.pad(x_nlc, ((0, 0), (3, 3), (0, 0)))
    slab1 = jnp.concatenate([xp3[:, k:k + Lx, :] for k in range(3)],
                            axis=-1).astype(jnp.bfloat16)  # (B, L+4, 3*Cin)
    wf2p = jnp.pad(kp['wf2'], ((0, 0), (0, out_pad - out_ch)))
    bf2p = jnp.pad(kp['bf2'], ((0, 0), (0, out_pad - out_ch)))

    args = (slab1, kp['w1'], kp['b1'], kp['t1p'], kp['w2'], kp['b2'],
            kp['wf1'], kp['bf1'], wf2p, bf2p)
    weight_bytes = sum(int(a.size) * a.dtype.itemsize for a in args[1:])

    # --- VMEM-aware batch block (v7x: 64 MiB physical; v5e/v6e: 128 MiB) ---
    try:
        phys_vmem = int(pltpu.get_tpu_info().vmem_capacity_bytes)
    except Exception:
        phys_vmem = 64 * 1024 * 1024                       # conservative (v7x-sized) fallback
    per_row_bytes = (2 * Lx * 3 * Cin * 2                                    # input, 2-deep buffer
                     + (Lx * 32 + (L2 + 2) * 32 + L2 * 64 + L4 * 64) * 4     # f32 activations
                     + (L2 * 96 + L4 * 64) * 2                               # bf16 im2col/flatten
                     + (128 + out_pad) * 4) * 2                              # z/out + 2x slack
    budget = max(4 * 1024 * 1024, phys_vmem // 3 - 2 * weight_bytes)
    bb = _pick_batch_block(B, per_row_bytes, budget)
    grid = (B // bb,)

    need = 2 * weight_bytes + bb * per_row_bytes + 2 * bb * out_pad * 4
    vmem_limit = int(min(phys_vmem * 3 // 4, max(16 * 1024 * 1024, 2 * need)))

    def full_spec(a):
        return pl.BlockSpec(a.shape, lambda i: (0,) * a.ndim)   # weights: grid-invariant blocks

    in_specs = [pl.BlockSpec((bb, Lx, 3 * Cin), lambda i: (i, 0, 0))] \
             + [full_spec(a) for a in args[1:]]
    out_specs = pl.BlockSpec((bb, out_pad), lambda i: (i, 0))

    flops = 2 * B * (Lx * 3 * Cin * 32 + L2 * 96 * 64 + L4 * 64 * 128 + 128 * out_pad)
    bytes_accessed = (slab1.size * slab1.dtype.itemsize + weight_bytes + B * out_pad * 4)

    out = pl.pallas_call(
        convnet_kernel,
        out_shape=jax.ShapeDtypeStruct((B, out_pad), jnp.float32),
        grid=grid,
        in_specs=in_specs,
        out_specs=out_specs,
        compiler_params=pltpu.CompilerParams(
            dimension_semantics=("parallel",),
            vmem_limit_bytes=vmem_limit),
        cost_estimate=pl.CostEstimate(flops=flops, transcendentals=0,
                                      bytes_accessed=int(bytes_accessed)),
    )(*args)
    return out[:, :out_ch]


def init_params(key, in_channels, out_channels, seq_length):
    """Deterministic synthetic params (PyTorch layouts) -> kernel layouts + f32 reference copy."""
    L4 = seq_length // 4
    eps = 1e-5
    ks = jax.random.split(key, 16)
    w1_t = jax.random.normal(ks[0], (32, in_channels, 3), jnp.float32) * 0.2
    b1_t = jax.random.normal(ks[1], (32,), jnp.float32) * 0.1
    g1 = 1.0 + 0.1 * jax.random.normal(ks[2], (32,), jnp.float32)
    be1 = 0.1 * jax.random.normal(ks[3], (32,), jnp.float32)
    m1 = 0.1 * jax.random.normal(ks[4], (32,), jnp.float32)
    v1 = jax.random.uniform(ks[5], (32,), jnp.float32, 0.5, 1.5)
    w2_t = jax.random.normal(ks[6], (64, 32, 3), jnp.float32) * 0.1
    b2_t = jax.random.normal(ks[7], (64,), jnp.float32) * 0.1
    g2 = 1.0 + 0.1 * jax.random.normal(ks[8], (64,), jnp.float32)
    be2 = 0.1 * jax.random.normal(ks[9], (64,), jnp.float32)
    m2 = 0.1 * jax.random.normal(ks[10], (64,), jnp.float32)
    v2 = jax.random.uniform(ks[11], (64,), jnp.float32, 0.5, 1.5)
    wf1_t = jax.random.normal(ks[12], (128, 64 * L4), jnp.float32) * 0.05
    bf1_t = jax.random.normal(ks[13], (128,), jnp.float32) * 0.1
    wf2_t = jax.random.normal(ks[14], (out_channels, 128), jnp.float32) * 0.05
    bf2_t = jax.random.normal(ks[15], (out_channels,), jnp.float32) * 0.1

    # eval-mode BN folded into per-channel scale/shift
    s1 = g1 / jnp.sqrt(v1 + eps)
    t1 = be1 - m1 * s1
    s2 = g2 / jnp.sqrt(v2 + eps)
    t2 = be2 - m2 * s2

    w1_kco = jnp.transpose(w1_t, (2, 1, 0))                         # (3, Cin, 32)
    w2_kco = jnp.transpose(w2_t, (2, 1, 0))                         # (3, 32, 64)
    # PyTorch flatten index = c*(L//4)+l  ->  reorder to (l, c, out)
    wf1_lco = jnp.transpose(wf1_t.reshape(128, 64, L4), (2, 1, 0))  # (L4, 64, 128)

    kernel_params = dict(
        # im2col slab ordering is k-major, channel-minor -> reshape (3, Cin, O) to (3*Cin, O)
        w1=w1_kco.reshape(3 * in_channels, 32).astype(jnp.bfloat16),
        b1=b1_t[None, :],
        t1p=(t1 / s1)[None, :],                                               # BN1 shift (scale folded below)
        w2=(w2_kco * s1[None, :, None]).reshape(3 * 32, 64).astype(jnp.bfloat16),     # BN1 scale folded (exact)
        b2=b2_t[None, :],
        wf1=(wf1_lco * s2[None, :, None]).reshape(L4 * 64, 128).astype(jnp.bfloat16),  # BN2 scale folded
        bf1=(bf1_t + jnp.einsum('lco,c->o', wf1_lco, t2))[None, :],           # BN2 shift folded (exact)
        wf2=wf2_t.T.astype(jnp.bfloat16),                                     # (128, out)
        bf2=bf2_t[None, :],
    )
    # un-folded full-f32 copy, original PyTorch op order, for the correctness reference
    ref_params = dict(
        w1=w1_kco, b1=b1_t[None, :], s1=s1[None, :], t1=t1[None, :],
        w2=w2_kco, b2=b2_t[None, :], s2=s2[None, :], t2=t2[None, :],
        wf1=wf1_lco, bf1=bf1_t[None, :], wf2=wf2_t.T, bf2=bf2_t[None, :],
    )
    return kernel_params, ref_params


def reference_forward(x_nlc, p):
    """Pure-JAX f32 reference with the original (un-folded) PyTorch op order."""
    B, L, _ = x_nlc.shape

    def conv3(h, w, b):
        Lh = h.shape[1]
        hp = jnp.pad(h, ((0, 0), (1, 1), (0, 0)))
        out = sum(jnp.einsum('blc,co->blo', hp[:, k:k + Lh, :], w[k]) for k in range(3))
        return out + b

    h = jnp.maximum(conv3(x_nlc, p['w1'], p['b1']), 0.0)
    h = jnp.max(h.reshape(B, L // 2, 2, 32), axis=2)
    h = h * p['s1'] + p['t1']
    g = jnp.maximum(conv3(h, p['w2'], p['b2']), 0.0)
    g = jnp.max(g.reshape(B, L // 4, 2, 64), axis=2)
    g = g * p['s2'] + p['t2']
    z = jnp.maximum(jnp.einsum('blc,lco->bo', g, p['wf1']) + p['bf1'], 0.0)
    return jnp.dot(z, p['wf2']) + p['bf2']


if __name__ == "__main__":
    B, Cin, L, Cout = 2, 4, 16, 8        # batch=2, in_channels=4, seq_length=16, out_channels=8
    key = jax.random.PRNGKey(0)
    kx, kp = jax.random.split(key)

    x_ncl = jax.random.normal(kx, (B, Cin, L), jnp.float32)   # PyTorch NCL input
    x_nlc = jnp.transpose(x_ncl, (0, 2, 1))                   # kernel layout NLC (channels on lanes)
    kernel_params, ref_params = init_params(kp, Cin, Cout, L)

    out = jax.block_until_ready(convnet_forward(x_nlc, kernel_params))
    ref = reference_forward(x_nlc, ref_params)

    assert out.shape == (B, Cout), out.shape
    # Kernel uses bf16 matmul operands (f32 accumulation); reference is full f32, hence the
    # relaxed tolerance. A genuine layout/semantics bug would produce O(0.3-1) deviations.
    assert jnp.allclose(out, ref, atol=5e-2, rtol=1e-1), (out, ref)
    print("KERNEL_OK")
</pallas_src>

<mosaic_0001>
module attributes {stable_mosaic.version = 11 : i64} {
  func.func @convnet_kernel(%arg0: i32, %arg1: memref<2x20x12xbf16, #tpu.memory_space<vmem>>, %arg2: memref<12x32xbf16, #tpu.memory_space<vmem>>, %arg3: memref<1x32xf32, #tpu.memory_space<vmem>>, %arg4: memref<1x32xf32, #tpu.memory_space<vmem>>, %arg5: memref<96x64xbf16, #tpu.memory_space<vmem>>, %arg6: memref<1x64xf32, #tpu.memory_space<vmem>>, %arg7: memref<256x128xbf16, #tpu.memory_space<vmem>>, %arg8: memref<1x128xf32, #tpu.memory_space<vmem>>, %arg9: memref<128x128xbf16, #tpu.memory_space<vmem>>, %arg10: memref<1x128xf32, #tpu.memory_space<vmem>>, %arg11: memref<2x128xf32, #tpu.memory_space<vmem>>) attributes {dimension_semantics = [#tpu.dimension_semantics<parallel>], iteration_bounds = array<i64: 1>, scalar_prefetch = 0 : i64, scratch_operands = 0 : i64, tpu.core_type = #tpu.core_type<tc>, window_params = [{transform_indices = @transform_0, window_bounds = array<i64: 2, 20, 12>}, {pipeline_mode = #tpu.pipeline_mode<synchronous>, transform_indices = @transform_1, window_bounds = array<i64: 12, 32>}, {pipeline_mode = #tpu.pipeline_mode<synchronous>, transform_indices = @transform_2, window_bounds = array<i64: 1, 32>}, {pipeline_mode = #tpu.pipeline_mode<synchronous>, transform_indices = @transform_3, window_bounds = array<i64: 1, 32>}, {pipeline_mode = #tpu.pipeline_mode<synchronous>, transform_indices = @transform_4, window_bounds = array<i64: 96, 64>}, {pipeline_mode = #tpu.pipeline_mode<synchronous>, transform_indices = @transform_5, window_bounds = array<i64: 1, 64>}, {pipeline_mode = #tpu.pipeline_mode<synchronous>, transform_indices = @transform_6, window_bounds = array<i64: 256, 128>}, {pipeline_mode = #tpu.pipeline_mode<synchronous>, transform_indices = @transform_7, window_bounds = array<i64: 1, 128>}, {pipeline_mode = #tpu.pipeline_mode<synchronous>, transform_indices = @transform_8, window_bounds = array<i64: 128, 128>}, {pipeline_mode = #tpu.pipeline_mode<synchronous>, transform_indices = @transform_9, window_bounds = array<i64: 1, 128>}, {transform_indices = @transform_10, window_bounds = array<i64: 2, 128>}]} {
    %c0 = arith.constant 0 : index
    %c0_0 = arith.constant 0 : index
    %c0_1 = arith.constant 0 : index
    %0 = vector.load %arg1[%c0, %c0_0, %c0_1] : memref<2x20x12xbf16, #tpu.memory_space<vmem>>, vector<2x20x12xbf16>
    %c0_2 = arith.constant 0 : index
    %c0_3 = arith.constant 0 : index
    %1 = vector.load %arg2[%c0_2, %c0_3] : memref<12x32xbf16, #tpu.memory_space<vmem>>, vector<12x32xbf16>
    "tpu.trace_start"() <{level = 10 : i32, message = "blc,co->blo"}> : () -> ()
    %cst = arith.constant dense<0.000000e+00> : vector<2x20x32xf32>
    %2 = tpu.matmul %0, %1, %cst {dimension_numbers = #tpu.dot_dimension_numbers<[2], [0], [0, 1], [1], [0, 0, 0, 1, 1, 1], [], []>} : vector<2x20x12xbf16>, vector<12x32xbf16>, vector<2x20x32xf32> -> vector<2x20x32xf32>
    "tpu.trace_stop"() : () -> ()
    %c0_4 = arith.constant 0 : index
    %c0_5 = arith.constant 0 : index
    %3 = vector.load %arg3[%c0_4, %c0_5] : memref<1x32xf32, #tpu.memory_space<vmem>>, vector<1x32xf32>
    %4 = vector.shape_cast %3 : vector<1x32xf32> to vector<1x1x32xf32>
    %5 = vector.broadcast %4 : vector<1x1x32xf32> to vector<2x20x32xf32>
    %6 = arith.addf %2, %5 : vector<2x20x32xf32>
    %cst_6 = arith.constant 0.000000e+00 : f32
    %7 = vector.broadcast %cst_6 : f32 to vector<2x20x32xf32>
    %8 = arith.maximumf %6, %7 : vector<2x20x32xf32>
    %9 = vector.shape_cast %8 : vector<2x20x32xf32> to vector<2x10x2x32xf32>
    %cst_7 = arith.constant dense<0xFF800000> : vector<2x10x32xf32>
    %10 = vector.multi_reduction <maximumf>, %9, %cst_7 [2] : vector<2x10x2x32xf32> to vector<2x10x32xf32>
    %c0_8 = arith.constant 0 : index
    %c0_9 = arith.constant 0 : index
    %11 = vector.load %arg4[%c0_8, %c0_9] : memref<1x32xf32, #tpu.memory_space<vmem>>, vector<1x32xf32>
    %12 = vector.shape_cast %11 : vector<1x32xf32> to vector<1x1x32xf32>
    %13 = vector.broadcast %12 : vector<1x1x32xf32> to vector<2x10x32xf32>
    %14 = arith.addf %10, %13 : vector<2x10x32xf32>
    %15 = tpu.iota {dimensions = array<i32: 1>} : vector<2x10x32xi32>
    %c0_i32 = arith.constant 0 : i32
    %16 = vector.broadcast %c0_i32 : i32 to vector<2x10x32xi32>
    %17 = arith.cmpi eq, %15, %16 : vector<2x10x32xi32>
    %c9_i32 = arith.constant 9 : i32
    %18 = vector.broadcast %c9_i32 : i32 to vector<2x10x32xi32>
    %19 = arith.cmpi eq, %15, %18 : vector<2x10x32xi32>
    %20 = arith.ori %17, %19 : vector<2x10x32xi1>
    %cst_10 = arith.constant 0.000000e+00 : f32
    %21 = vector.broadcast %cst_10 : f32 to vector<2x10x32xf32>
    %22 = arith.select %20, %21, %14 : vector<2x10x32xi1>, vector<2x10x32xf32>
    %23 = arith.truncf %22 : vector<2x10x32xf32> to vector<2x10x32xbf16>
    %24 = vector.extract_strided_slice %23 {offsets = [0, 0, 0], sizes = [2, 8, 32], strides = [1, 1, 1]} : vector<2x10x32xbf16> to vector<2x8x32xbf16>
    %25 = vector.extract_strided_slice %23 {offsets = [0, 1, 0], sizes = [2, 8, 32], strides = [1, 1, 1]} : vector<2x10x32xbf16> to vector<2x8x32xbf16>
    %26 = vector.extract_strided_slice %23 {offsets = [0, 2, 0], sizes = [2, 8, 32], strides = [1, 1, 1]} : vector<2x10x32xbf16> to vector<2x8x32xbf16>
    %27 = tpu.concatenate %24, %25, %26 in 2 : vector<2x8x32xbf16>, vector<2x8x32xbf16>, vector<2x8x32xbf16> -> vector<2x8x96xbf16>
    %c0_11 = arith.constant 0 : index
    %c0_12 = arith.constant 0 : index
    %28 = vector.load %arg5[%c0_11, %c0_12] : memref<96x64xbf16, #tpu.memory_space<vmem>>, vector<96x64xbf16>
    "tpu.trace_start"() <{level = 10 : i32, message = "blc,co->blo"}> : () -> ()
    %cst_13 = arith.constant dense<0.000000e+00> : vector<2x8x64xf32>
    %29 = tpu.matmul %27, %28, %cst_13 {dimension_numbers = #tpu.dot_dimension_numbers<[2], [0], [0, 1], [1], [0, 0, 0, 1, 1, 1], [], []>} : vector<2x8x96xbf16>, vector<96x64xbf16>, vector<2x8x64xf32> -> vector<2x8x64xf32>
    "tpu.trace_stop"() : () -> ()
    %c0_14 = arith.constant 0 : index
    %c0_15 = arith.constant 0 : index
    %30 = vector.load %arg6[%c0_14, %c0_15] : memref<1x64xf32, #tpu.memory_space<vmem>>, vector<1x64xf32>
    %31 = vector.shape_cast %30 : vector<1x64xf32> to vector<1x1x64xf32>
    %32 = vector.broadcast %31 : vector<1x1x64xf32> to vector<2x8x64xf32>
    %33 = arith.addf %29, %32 : vector<2x8x64xf32>
    %cst_16 = arith.constant 0.000000e+00 : f32
    %34 = vector.broadcast %cst_16 : f32 to vector<2x8x64xf32>
    %35 = arith.maximumf %33, %34 : vector<2x8x64xf32>
    %36 = vector.shape_cast %35 : vector<2x8x64xf32> to vector<2x4x2x64xf32>
    %cst_17 = arith.constant dense<0xFF800000> : vector<2x4x64xf32>
    %37 = vector.multi_reduction <maximumf>, %36, %cst_17 [2] : vector<2x4x2x64xf32> to vector<2x4x64xf32>
    %38 = arith.truncf %37 : vector<2x4x64xf32> to vector<2x4x64xbf16>
    %39 = vector.extract_strided_slice %38 {offsets = [0, 0, 0], sizes = [2, 1, 64], strides = [1, 1, 1]} : vector<2x4x64xbf16> to vector<2x1x64xbf16>
    %40 = vector.shape_cast %39 : vector<2x1x64xbf16> to vector<2x64xbf16>
    %41 = vector.extract_strided_slice %38 {offsets = [0, 1, 0], sizes = [2, 1, 64], strides = [1, 1, 1]} : vector<2x4x64xbf16> to vector<2x1x64xbf16>
    %42 = vector.shape_cast %41 : vector<2x1x64xbf16> to vector<2x64xbf16>
    %43 = vector.extract_strided_slice %38 {offsets = [0, 2, 0], sizes = [2, 1, 64], strides = [1, 1, 1]} : vector<2x4x64xbf16> to vector<2x1x64xbf16>
    %44 = vector.shape_cast %43 : vector<2x1x64xbf16> to vector<2x64xbf16>
    %45 = vector.extract_strided_slice %38 {offsets = [0, 3, 0], sizes = [2, 1, 64], strides = [1, 1, 1]} : vector<2x4x64xbf16> to vector<2x1x64xbf16>
    %46 = vector.shape_cast %45 : vector<2x1x64xbf16> to vector<2x64xbf16>
    %47 = tpu.concatenate %40, %42, %44, %46 in 1 : vector<2x64xbf16>, vector<2x64xbf16>, vector<2x64xbf16>, vector<2x64xbf16> -> vector<2x256xbf16>
    %c0_18 = arith.constant 0 : index
    %c0_19 = arith.constant 0 : index
    %48 = vector.load %arg7[%c0_18, %c0_19] : memref<256x128xbf16, #tpu.memory_space<vmem>>, vector<256x128xbf16>
    %cst_20 = arith.constant dense<0.000000e+00> : vector<2x128xf32>
    %49 = tpu.matmul %47, %48, %cst_20 {dimension_numbers = #tpu.dot_dimension_numbers<[1], [0], [0], [1], [0, 0, 1, 1], [], []>} : vector<2x256xbf16>, vector<256x128xbf16>, vector<2x128xf32> -> vector<2x128xf32>
    %c0_21 = arith.constant 0 : index
    %c0_22 = arith.constant 0 : index
    %50 = vector.load %arg8[%c0_21, %c0_22] : memref<1x128xf32, #tpu.memory_space<vmem>>, vector<1x128xf32>
    %51 = vector.broadcast %50 : vector<1x128xf32> to vector<2x128xf32>
    %52 = arith.addf %49, %51 : vector<2x128xf32>
    %cst_23 = arith.constant 0.000000e+00 : f32
    %53 = vector.broadcast %cst_23 : f32 to vector<2x128xf32>
    %54 = arith.maximumf %52, %53 : vector<2x128xf32>
    %55 = arith.truncf %54 : vector<2x128xf32> to vector<2x128xbf16>
    %c0_24 = arith.constant 0 : index
    %c0_25 = arith.constant 0 : index
    %56 = vector.load %arg9[%c0_24, %c0_25] : memref<128x128xbf16, #tpu.memory_space<vmem>>, vector<128x128xbf16>
    %cst_26 = arith.constant dense<0.000000e+00> : vector<2x128xf32>
    %57 = tpu.matmul %55, %56, %cst_26 {dimension_numbers = #tpu.dot_dimension_numbers<[1], [0], [0], [1], [0, 0, 1, 1], [], []>} : vector<2x128xbf16>, vector<128x128xbf16>, vector<2x128xf32> -> vector<2x128xf32>
    %c0_27 = arith.constant 0 : index
    %c0_28 = arith.constant 0 : index
    %58 = vector.load %arg10[%c0_27, %c0_28] : memref<1x128xf32, #tpu.memory_space<vmem>>, vector<1x128xf32>
    %59 = vector.broadcast %58 : vector<1x128xf32> to vector<2x128xf32>
    %60 = arith.addf %57, %59 : vector<2x128xf32>
    %c0_29 = arith.constant 0 : index
    %c0_30 = arith.constant 0 : index
    %61 = vector.load %arg11[%c0_29, %c0_30] : memref<2x128xf32, #tpu.memory_space<vmem>>, vector<2x128xf32>
    tpu.vector_store %arg11[%c0_29, %c0_30], %60 {strides = array<i32>} : memref<2x128xf32, #tpu.memory_space<vmem>>, vector<2x128xf32>,
    return
  }
  func.func @transform_0(%arg0: i32) -> (i32, i32, i32) {
    %c0_i32 = arith.constant 0 : i32
    %c0_i32_0 = arith.constant 0 : i32
    %c0_i32_1 = arith.constant 0 : i32
    return %arg0, %c0_i32, %c0_i32_0 : i32, i32, i32
  }
  func.func @transform_1(%arg0: i32) -> (i32, i32) {
    %c0_i32 = arith.constant 0 : i32
    %c0_i32_0 = arith.constant 0 : i32
    %c0_i32_1 = arith.constant 0 : i32
    return %c0_i32, %c0_i32_0 : i32, i32
  }
  func.func @transform_2(%arg0: i32) -> (i32, i32) {
    %c0_i32 = arith.constant 0 : i32
    %c0_i32_0 = arith.constant 0 : i32
    %c0_i32_1 = arith.constant 0 : i32
    return %c0_i32, %c0_i32_0 : i32, i32
  }
  func.func @transform_3(%arg0: i32) -> (i32, i32) {
    %c0_i32 = arith.constant 0 : i32
    %c0_i32_0 = arith.constant 0 : i32
    %c0_i32_1 = arith.constant 0 : i32
    return %c0_i32, %c0_i32_0 : i32, i32
  }
  func.func @transform_4(%arg0: i32) -> (i32, i32) {
    %c0_i32 = arith.constant 0 : i32
    %c0_i32_0 = arith.constant 0 : i32
    %c0_i32_1 = arith.constant 0 : i32
    return %c0_i32, %c0_i32_0 : i32, i32
  }
  func.func @transform_5(%arg0: i32) -> (i32, i32) {
    %c0_i32 = arith.constant 0 : i32
    %c0_i32_0 = arith.constant 0 : i32
    %c0_i32_1 = arith.constant 0 : i32
    return %c0_i32, %c0_i32_0 : i32, i32
  }
  func.func @transform_6(%arg0: i32) -> (i32, i32) {
    %c0_i32 = arith.constant 0 : i32
    %c0_i32_0 = arith.constant 0 : i32
    %c0_i32_1 = arith.constant 0 : i32
    return %c0_i32, %c0_i32_0 : i32, i32
  }
  func.func @transform_7(%arg0: i32) -> (i32, i32) {
    %c0_i32 = arith.constant 0 : i32
    %c0_i32_0 = arith.constant 0 : i32
    %c0_i32_1 = arith.constant 0 : i32
    return %c0_i32, %c0_i32_0 : i32, i32
  }
  func.func @transform_8(%arg0: i32) -> (i32, i32) {
    %c0_i32 = arith.constant 0 : i32
    %c0_i32_0 = arith.constant 0 : i32
    %c0_i32_1 = arith.constant 0 : i32
    return %c0_i32, %c0_i32_0 : i32, i32
  }
  func.func @transform_9(%arg0: i32) -> (i32, i32) {
    %c0_i32 = arith.constant 0 : i32
    %c0_i32_0 = arith.constant 0 : i32
    %c0_i32_1 = arith.constant 0 : i32
    return %c0_i32, %c0_i32_0 : i32, i32
  }
  func.func @transform_10(%arg0: i32) -> (i32, i32) {
    %c0_i32 = arith.constant 0 : i32
    %c0_i32_0 = arith.constant 0 : i32
    return %arg0, %c0_i32 : i32, i32
  }
}

</mosaic_0001>

<bundles_post_ra>
// kernel: tpu_custom_call.1
= control target key start
LH: loop header
LB: loop body
LE: loop exit
PB: predicated region body
PF: predicated region fallthrough
CT: control target
= control target key end

     0   :  { %15 = vsyncpa [#allocation3], 0  ;;  %s1871_s0 = inlined_call_operand.vmem [shape: bf16[2,20,12], index: 0, kind: input, shape index: {}]   ;;  %s1872_s1 = inlined_call_operand.vmem [shape: bf16[12,32], index: 1, kind: input, shape index: {}]   ;;  %s1873_s2 = inlined_call_operand.vmem [shape: f32[1,32], index: 2, kind: input, shape index: {}]   ;;  %s1874_s3 = inlined_call_operand.vmem [shape: f32[1,32], index: 3, kind: input, shape index: {}]   ;;  %s1875_s4 = inlined_call_operand.vmem [shape: bf16[96,64], index: 4, kind: input, shape index: {}]   ;;  %s1876_s5 = inlined_call_operand.hbm [shape: f32[1,64], index: 5, kind: input, shape index: {}]   ;;  %s1877_s6 = inlined_call_operand.vmem [shape: bf16[256,128], index: 6, kind: input, shape index: {}]   ;;  %s1878_s7 = inlined_call_operand.vmem [shape: f32[1,128], index: 7, kind: input, shape index: {}]   ;;  %s1879_s8 = inlined_call_operand.hbm [shape: bf16[128,128], index: 8, kind: input, shape index: {}]   ;;  %s1880_s9 = inlined_call_operand.vmem [shape: f32[1,128], index: 9, kind: input, shape index: {}]   ;;  %s1881_s10 = inlined_call_operand.hbm [shape: f32[2,128], index: 10, kind: output, shape index: {}]  }
   0x1   :  { %16 = vsyncpa [#allocation6], 0 }
   0x2   :  { %17 = vsyncpa [#allocation4], 0  ;;  %s1478_s13 = smov [#allocation2]   ;;  %s1479_s15 = smov [#allocation5]  }
   0x3   :  { %s34_s14 = sshll.u32 %s1478_s13, 4  ;;  %s47_s16 = sshll.u32 %s1479_s15, 4  ;;  %s35_s14 = int_to_ptr.vmem [resolvable:$true] %s34_s14  ;;  %s1542_s16 = int_to_ptr.vmem [resolvable:$true] %s47_s16 }
   0x4   :  { %s1406_s19 = scalar_lea.hbm %s1876_s5, 16 }
   0x5   :  { %p1407_p0 = scmp.ne.s32.totalorder %s1876_s5, %s1406_s19  ;;  %p1410_p1 = scmp.lt.u32.totalorder %s1406_s19, %s1876_s5 }
   0x7   :  { %p1412_p2 = pnand %p1410_p1, %p1407_p0 }
   0x9   :  { %1415 = shalt.err (!%p1412_p2)
}
   0xa   :  { %s1416_s24 = scalar_lea.vmem %s35_s14, 16  ;;  %s1420_s25 = scalar_lea.vmem %s35_s14, 32 }
   0xb   :  { %p1417_p3 = scmp.ne.s32.totalorder %s35_s14, %s1416_s24  ;;  %p1421_p4 = scmp.lt.s32.totalorder %s35_s14, %s35_s14 }
   0xc   :  { %p1422_p5 = scmp.lt.s32.totalorder %s1420_s25, %s1416_s24 }
   0xe   :  { %p1423_p6 = por %p1422_p5, %p1421_p4 }
  0x10   :  { %p1424_p7 = pnand %p1423_p6, %p1417_p3 }
  0x12   :  { %1427 = shalt.err (!%p1424_p7)
}
  0x13   :  { %37 = dma.hbm_to_vmem [thread:$0]  %s1876_s5, 16, %s35_s14, [#allocation3]  }
  0x14   :  { %s1428_s30 = scalar_lea.hbm %s1879_s8, 1024 }
  0x15   :  { %p1429_p8 = scmp.ne.s32.totalorder %s1879_s8, %s1428_s30  ;;  %p1432_p9 = scmp.lt.u32.totalorder %s1428_s30, %s1879_s8 }
  0x17   :  { %p1434_p10 = pnand %p1432_p9, %p1429_p8 }
  0x19   :  { %1437 = shalt.err (!%p1434_p10)
}
  0x1a   :  { %s1438_s17 = scalar_lea.vmem %s1542_s16, 1024  ;;  %p1443_p12 = scmp.lt.s32.totalorder %s1542_s16, %s1542_s16 }
  0x1b   :  { %p1439_p11 = scmp.ne.s32.totalorder %s1542_s16, %s1438_s17  ;;  %p1444_p13 = scmp.lt.s32.totalorder %s1438_s17, %s1438_s17 }
  0x1d   :  { %p1445_p0 = por %p1444_p13, %p1443_p12 }
  0x1f   :  { %p1446_p1 = pnand %p1445_p0, %p1439_p11 }
  0x21   :  { %1449 = shalt.err (!%p1446_p1)
}
  0x22   :  { %s1480_s5 = smov 64   ;;  %s1481_s14 = smov 4  }
  0x23   :  { %53 = dma.hbm_to_vmem [thread:$0]  %s1879_s8, 1024, %s1542_s16, [#allocation6], %s1480_s5, %s1480_s5, %s1481_s14  }
  0x24   :  { %1472 = dma.done.wait [#allocation3], 16  }
  0x25   :  { %1473 = vsyncadd [#allocation3], 4294967280 }
  0x26   :  { %1474 = dma.done.wait [#allocation6], 1024  }
  0x27   :  { %1475 = vsyncadd [#allocation6], 4294966272  ;;  %v1482_v0 = vmov 0.0   ;;  %vm1483_vm0 = vmmov 0   ;;  %v135_v1 = vlaneseq  ;;  %v1484_v2 = vmov 1983009808  }
  0x28   :  { %1316 = vmatprep.subr.bf16.mxu0 %v1482_v0  ;;  %1318 = vmatprep.mubr.msk.bf16.mxu0 %vm1483_vm0, %v1482_v0  ;;  %v133_v3 = vunpack.c.l.s4 %v1484_v2  ;;  %vm193_vm1 = vcmask 1045504   ;;  %v1375_v6 = vld [vmem:[%s1872_s1] sm:$0x3f]   ;;  %vm183_vm2 = vcmask 97280   ;;  %v1377_v32 = vld [vmem:[%s1875_s4 + $0x8] sm:$0xff]   ;;  %vm388_vm3 = vcmask 254976  }
  0x29   :  { %1330 = vmatprep.subr.bf16.mxu1 %v1482_v0  ;;  %1342 = vmatprep.mubr.msk.bf16.mxu1 %vm1483_vm0, %v1482_v0  ;;  %v1581_v5 = vshrl.u32 %v135_v1, 7  ;;  %v1228_v7 = vld.sshfl [vmem:[%s1871_s0] sm:$0x33 pattern:$0x76325410]  ;;  %v195_v8 = vsel %vm193_vm1, %v1375_v6, 0 }
  0x2a   :  { %v134_v4 = vunpack.c.0.s8 %v133_v3  ;;  %v1229_v9 = vld.sshfl [vmem:[%s1871_s0 + $0x4] sm:$0x33 pattern:$0x76325410]  ;;  %v90_v10 = vcombine.high %v1228_v7, %v1228_v7  ;;  %1317 = vmatpush3.bf16.msra.mxu0 %v195_v8  ;;  %v1630_v33 = vld [vmem:[%s1873_s2] ss:$0 sm:$0xff] }
  0x2b   :  { %v98_v12 = vcombine.high %v1229_v9, %v1229_v9  ;;  %v1230_v13 = vld.sshfl [vmem:[%s1871_s0 + $0x8] sm:$0x3 pattern:$0x76325410]  ;;  %v1376_v31 = vld [vmem:[%s1875_s4] sm:$0xff]   ;;  %v129_v34 = vcombine.high %v1630_v33, %v1630_v33  ;;  %v178_v54 = vcombine.low %v1630_v33, %v1630_v33  ;;  %vm586_vm4 = vcmask 1041409  }
  0x2c   :  { %v1593_v11 = vsub.s32 %v134_v4, %v1581_v5  ;;  %v130_v14 = vcombine.low %v1228_v7, %v90_v10  ;;  %v1231_v15 = vld.sshfl [vmem:[%s1871_s0 + $0xc] sm:$0x33 pattern:$0x76325410]  ;;  %1331 = vmatpush3.bf16.msra.mxu1 %v1376_v31  ;;  %vm589_vm5 = vcmask 1042434   ;;  %vm592_vm6 = vcmask 1043459  }
  0x2d   :  { %v131_v16 = vcombine.low %v1229_v9, %v98_v12  ;;  %v1232_v17 = vld.sshfl [vmem:[%s1871_s0 + $0x10] sm:$0x33 pattern:$0x76325410]  ;;  %v113_v18 = vcombine.high %v1231_v15, %v1231_v15  ;;  %v147_v21 = vcombine.low %v1230_v13, %v1231_v15  ;;  %1332 = vmatprep.subr.bf16.mxu1 %v1482_v0  ;;  %v177_v35 = vcombine.low %v1630_v33, %v129_v34  ;;  %s1485_s23 = smov 32   ;;  %s1486_s30 = smov [#allocation7]  }
  0x2e   :  { %v138_v19 = vrot.slane %v130_v14, %v1593_v11  ;;  %v1233_v26 = vld.sshfl [vmem:[%s1871_s0 + $0x14] sm:$0x3 pattern:$0x76325410]  ;;  %v121_v28 = vcombine.high %v1232_v17, %v1232_v17  ;;  %v1644_v56 = vcombine.low %v129_v34, %v1630_v33  ;;  %vm595_vm7 = vcmask 1044484   ;;  %s1217_s11 = sshll.u32 %s1486_s30, 4  ;;  %s1218_s11 = int_to_ptr.vmem [resolvable:$true] %s1217_s11 }
  0x2f   :  { %v145_v20 = vrot.slane %v131_v16, %v1593_v11  ;;  %v148_v22 = vcombine.low %v113_v18, %v1232_v17  ;;  %v155_v24 = vrot.slane %v147_v21, %v1593_v11  ;;  %vm598_vm8 = vcmask 1045509   ;;  %p1455_p3 = scmp.lt.s32.totalorder %s1218_s11, %s1218_s11 }
  0x30   :  { %v164_v29 = vcombine.low %v121_v28, %v1233_v26  ;;  %1333 = vmatpush3.bf16.msra.mxu1 %v1377_v32  ;;  %vm601_vm9 = vcmask 1046534   ;;  %vm604_vm10 = vcmask 1047559   ;;  %vm559_vm11 = vcmp.eq.s32.totalorder %v1581_v5, 0 }
  0x31   :  { %v146_v23 = vcombine.low %v138_v19, %v145_v20  ;;  %v162_v25 = vrot.slane %v148_v22, %v1593_v11  ;;  %1334 = vmatprep.subr.bf16.mxu1 %v1482_v0  ;;  %vm660_vm13 = vcmask 261120   ;;  %vm665_vm14 = vcmask 523264  }
  0x32   :  { %v171_v30 = vrot.slane %v164_v29, %v1593_v11  ;;  %vm730_vm15 = vcmask 785408  }
  0x33   :  { %1319 = vmatmul.mubr.msk.bf16.vlgmr.msra.gmra.mrb[0].mxu0 %vm183_vm2, %v146_v23  ;;  %v163_v27 = vcombine.low %v155_v24, %v162_v25 }
  0x34   :  { %1322 = vmatprep.mubr.msk.bf16.mxu0 %vm1483_vm0, %v1482_v0 }
  0x3b   :  { %1323 = vmatmul.mubr.msk.bf16.gmra.mrb[4].mxu0 %vm183_vm2, %v163_v27 }
  0x3c   :  { %1326 = vmatprep.mubr.msk.bf16.mxu0 %vm1483_vm0, %v1482_v0 }
  0x43   :  { %1327 = vmatmul.mubr.msk.bf16.gmra.mrb[8].mxu0 %vm183_vm2, %v171_v30 }
 0x106   :  { %v231_v36 = vpop.f32.mrb[0].mxu0 }
 0x107   :  { %v232_v37 = vadd.f32 %v231_v36, %v177_v35  ;;  %v1320_v38 = vpop.f32.mrb[1].mxu0 }
 0x108   :  { %v234_v39 = vpop.f32.mrb[2].mxu0 }
 0x109   :  { %v258_v40 = vcombine.high %v232_v37, %v232_v37  ;;  %v268_v41 = vmax.f32 %v232_v37, 0.0  ;;  %v235_v42 = vadd.f32 %v234_v39, %v177_v35  ;;  %v1321_v43 = vpop.f32.mrb[3].mxu0 }
 0x10b   :  { %v269_v44 = vmax.f32 %v258_v40, 0.0  ;;  %v294_v45 = vrot.slane %v268_v41, %v1593_v11  ;;  %v259_v46 = vcombine.high %v235_v42, %v235_v42  ;;  %v270_v47 = vmax.f32 %v235_v42, 0.0 }
 0x10d   :  { %v295_v48 = vcombine.high %v294_v45, %v294_v45  ;;  %v302_v49 = vrot.slane %v269_v44, %v1593_v11  ;;  %v389_v50 = vsel %vm388_vm3, %v294_v45, -inf  ;;  %v271_v51 = vmax.f32 %v259_v46, 0.0 }
 0x10e   :  { %v390_v52 = vrot.slane %v389_v50, 4  ;;  %v310_v53 = vrot.slane %v270_v47, %v1593_v11  ;;  %v1641_v55 = vpop.f32.mrb[4].mxu0 }
 0x10f   :  { %v303_v57 = vcombine.high %v302_v49, %v302_v49  ;;  %v396_v58 = vsel %vm388_vm3, %v295_v48, -inf  ;;  %v403_v59 = vsel %vm388_vm3, %v302_v49, -inf  ;;  %v318_v60 = vrot.slane %v271_v51, %v1593_v11  ;;  %v1324_v61 = vpop.f32.mrb[5].mxu0  ;;  %v1659_v51 = vld [vmem:[%s1874_s3] ss:$0 sm:$0xff] }
 0x110   :  { %v391_v62 = vmax.f32 %v389_v50, %v390_v52  ;;  %v397_v63 = vrot.slane %v396_v58, 4  ;;  %v404_v1 = vrot.slane %v403_v59, 4  ;;  %v311_v2 = vcombine.high %v310_v53, %v310_v53  ;;  %v1649_v3 = vpop.f32.mrb[6].mxu0 }
 0x111   :  { %v410_v4 = vsel %vm388_vm3, %v303_v57, -inf  ;;  %v319_v6 = vcombine.high %v318_v60, %v318_v60  ;;  %v417_v7 = vsel %vm388_vm3, %v310_v53, -inf  ;;  %v431_v8 = vsel %vm388_vm3, %v318_v60, -inf  ;;  %v1325_v9 = vpop.f32.mrb[7].mxu0 }
 0x112   :  { %v392_v10 = vrot.slane %v391_v62, 2  ;;  %v398_v12 = vmax.f32 %v396_v58, %v397_v63  ;;  %v405_v13 = vmax.f32 %v403_v59, %v404_v1  ;;  %v411_v14 = vrot.slane %v410_v4, 4 }
 0x113   :  { %v418_v15 = vrot.slane %v417_v7, 4  ;;  %v424_v16 = vsel %vm388_vm3, %v311_v2, -inf  ;;  %v432_v17 = vrot.slane %v431_v8, 4  ;;  %v438_v18 = vsel %vm388_vm3, %v319_v6, -inf }
 0x114   :  { %v393_v19 = vmax.f32 %v391_v62, %v392_v10  ;;  %v399_v20 = vrot.slane %v398_v12, 2  ;;  %v406_v21 = vrot.slane %v405_v13, 2  ;;  %v412_v22 = vmax.f32 %v410_v4, %v411_v14 }
 0x115   :  { %v419_v23 = vmax.f32 %v417_v7, %v418_v15  ;;  %v425_v24 = vrot.slane %v424_v16, 4  ;;  %v433_v25 = vmax.f32 %v431_v8, %v432_v17  ;;  %v439_v26 = vrot.slane %v438_v18, 4 }
 0x116   :  { %v394_v27 = vrot.slane %v393_v19, 1  ;;  %v400_v28 = vmax.f32 %v398_v12, %v399_v20  ;;  %v407_v29 = vmax.f32 %v405_v13, %v406_v21  ;;  %v413_v30 = vrot.slane %v412_v22, 2  ;;  %v247_v31 = vpop.f32.mrb[8].mxu0 }
 0x117   :  { %v420_v32 = vrot.slane %v419_v23, 2  ;;  %v426_v34 = vmax.f32 %v424_v16, %v425_v24  ;;  %v434_v35 = vrot.slane %v433_v25, 2  ;;  %v440_v36 = vmax.f32 %v438_v18, %v439_v26  ;;  %v1328_v37 = vpop.f32.mrb[9].mxu0 }
 0x118   :  { %v401_v38 = vrot.slane %v400_v28, 1  ;;  %v408_v39 = vrot.slane %v407_v29, 1  ;;  %v414_v40 = vmax.f32 %v412_v22, %v413_v30  ;;  %v250_v41 = vpop.f32.mrb[10].mxu0  ;;  %v395_v47 = vmax.f32 %v393_v19, %v394_v27 }
 0x119   :  { %v421_v42 = vmax.f32 %v419_v23, %v420_v32  ;;  %v427_v43 = vrot.slane %v426_v34, 2  ;;  %v435_v44 = vmax.f32 %v433_v25, %v434_v35  ;;  %v441_v45 = vrot.slane %v440_v36, 2  ;;  %v1329_v46 = vpop.f32.mrb[11].mxu0 }
 0x11a   :  { %v402_v48 = vmax.f32 %v400_v28, %v401_v38  ;;  %v409_v49 = vmax.f32 %v407_v29, %v408_v39  ;;  %v415_v50 = vrot.slane %v414_v40, 1  ;;  %v240_v62 = vadd.f32 %v1641_v55, %v178_v54 }
 0x11b   :  { %v422_v52 = vrot.slane %v421_v42, 1  ;;  %v428_v53 = vmax.f32 %v426_v34, %v427_v43  ;;  %v436_v57 = vrot.slane %v435_v44, 1  ;;  %v442_v58 = vmax.f32 %v440_v36, %v441_v45 }
 0x11c   :  { %v416_v59 = vmax.f32 %v414_v40, %v415_v50  ;;  %v537_v60 = vadd.f32 %v1659_v51, %v402_v48  ;;  %v538_v61 = vadd.f32 %v1659_v51, %v409_v49  ;;  %v536_v6 = vadd.f32 %v1659_v51, %v395_v47 }
 0x11d   :  { %v423_v63 = vmax.f32 %v421_v42, %v422_v52  ;;  %v429_v1 = vrot.slane %v428_v53, 1  ;;  %v437_v2 = vmax.f32 %v435_v44, %v436_v57  ;;  %v443_v4 = vrot.slane %v442_v58, 1 }
 0x11e   :  { %v539_v7 = vadd.f32 %v1659_v51, %v416_v59  ;;  %v585_v8 = vrot.slane %v537_v60, 7  ;;  %v260_v9 = vcombine.high %v240_v62, %v240_v62  ;;  %v588_v10 = vrot.slane %v538_v61, 6 }
 0x11f   :  { %v430_v12 = vmax.f32 %v428_v53, %v429_v1  ;;  %v1670_v13 = vadd.f32 %v1659_v51, %v423_v63  ;;  %v1673_v14 = vadd.f32 %v1659_v51, %v437_v2  ;;  %v272_v54 = vmax.f32 %v240_v62, 0.0 }
 0x120   :  { %v587_v33 = vsel %vm586_vm4, %v585_v8, %v536_v6  ;;  %v273_v55 = vmax.f32 %v260_v9, 0.0  ;;  %v591_v15 = vrot.slane %v539_v7, 5  ;;  %v1676_v16 = vmax.f32 %v442_v58, %v443_v4 }
 0x121   :  { %v1679_v17 = vadd.f32 %v1659_v51, %v430_v12  ;;  %v1682_v18 = vadd.s32 8, %v1581_v5  ;;  %v326_v19 = vrot.slane %v272_v54, %v1593_v11  ;;  %v243_v21 = vadd.f32 %v1649_v3, %v1644_v56 }
 0x122   :  { %v334_v20 = vrot.slane %v273_v55, %v1593_v11  ;;  %v248_v22 = vadd.f32 %v247_v31, %v1644_v56  ;;  %v590_v23 = vsel %vm589_vm5, %v588_v10, %v587_v33  ;;  %v594_v24 = vrot.slane %v1670_v13, 4 }
 0x123   :  { %v597_v25 = vrot.slane %v1679_v17, 3  ;;  %v600_v26 = vrot.slane %v1673_v14, 2  ;;  %v327_v27 = vcombine.high %v326_v19, %v326_v19  ;;  %v445_v29 = vsel %vm388_vm3, %v326_v19, -inf }
 0x124   :  { %v335_v28 = vcombine.high %v334_v20, %v334_v20  ;;  %v459_v30 = vsel %vm388_vm3, %v334_v20, -inf  ;;  %v446_v32 = vrot.slane %v445_v29, 4  ;;  %v261_v35 = vcombine.high %v243_v21, %v243_v21 }
 0x125   :  { %v460_v34 = vrot.slane %v459_v30, 4  ;;  %v274_v3 = vmax.f32 %v243_v21, 0.0  ;;  %v452_v56 = vsel %vm388_vm3, %v327_v27, -inf  ;;  %v262_v36 = vcombine.high %v248_v22, %v248_v22 }
 0x126   :  { %v466_v31 = vsel %vm388_vm3, %v335_v28, -inf  ;;  %v276_v37 = vmax.f32 %v248_v22, 0.0  ;;  %v447_v38 = vmax.f32 %v445_v29, %v446_v32  ;;  %v453_v39 = vrot.slane %v452_v56, 4 }
 0x127   :  { %v461_v40 = vmax.f32 %v459_v30, %v460_v34  ;;  %v467_v41 = vrot.slane %v466_v31, 4  ;;  %v275_v42 = vmax.f32 %v261_v35, 0.0  ;;  %v342_v43 = vrot.slane %v274_v3, %v1593_v11 }
 0x128   :  { %v277_v44 = vmax.f32 %v262_v36, 0.0  ;;  %v1699_v45 = vsel %vm592_vm6, %v591_v15, %v590_v23  ;;  %v448_v46 = vrot.slane %v447_v38, 2  ;;  %v454_v47 = vmax.f32 %v452_v56, %v453_v39 }
 0x129   :  { %v462_v48 = vrot.slane %v461_v40, 2  ;;  %v468_v49 = vmax.f32 %v466_v31, %v467_v41  ;;  %v343_v50 = vcombine.high %v342_v43, %v342_v43  ;;  %v350_v52 = vrot.slane %v275_v42, %v1593_v11 }
 0x12a   :  { %v473_v53 = vsel %vm388_vm3, %v342_v43, -inf  ;;  %v358_v57 = vrot.slane %v276_v37, %v1593_v11  ;;  %v449_v58 = vmax.f32 %v447_v38, %v448_v46  ;;  %v455_v59 = vrot.slane %v454_v47, 2 }
 0x12b   :  { %v463_v60 = vmax.f32 %v461_v40, %v462_v48  ;;  %v469_v61 = vrot.slane %v468_v49, 2  ;;  %v351_v62 = vcombine.high %v350_v52, %v350_v52  ;;  %v474_v63 = vrot.slane %v473_v53, 4 }
 0x12c   :  { %v480_v1 = vsel %vm388_vm3, %v343_v50, -inf  ;;  %v487_v2 = vsel %vm388_vm3, %v350_v52, -inf  ;;  %v450_v4 = vrot.slane %v449_v58, 1  ;;  %v456_v6 = vmax.f32 %v454_v47, %v455_v59 }
 0x12d   :  { %v464_v7 = vrot.slane %v463_v60, 1  ;;  %v470_v8 = vmax.f32 %v468_v49, %v469_v61  ;;  %v475_v9 = vmax.f32 %v473_v53, %v474_v63  ;;  %v481_v10 = vrot.slane %v480_v1, 4 }
 0x12e   :  { %v488_v12 = vrot.slane %v487_v2, 4  ;;  %v494_v33 = vsel %vm388_vm3, %v351_v62, -inf  ;;  %v457_v54 = vrot.slane %v456_v6, 1  ;;  %v359_v19 = vcombine.high %v358_v57, %v358_v57 }
 0x12f   :  { %v465_v55 = vmax.f32 %v463_v60, %v464_v7  ;;  %v471_v15 = vrot.slane %v470_v8, 1  ;;  %v476_v20 = vrot.slane %v475_v9, 2  ;;  %v482_v21 = vmax.f32 %v480_v1, %v481_v10 }
 0x130   :  { %v489_v22 = vmax.f32 %v487_v2, %v488_v12  ;;  %v495_v23 = vrot.slane %v494_v33, 4  ;;  %v451_v27 = vmax.f32 %v449_v58, %v450_v4  ;;  %v458_v28 = vmax.f32 %v456_v6, %v457_v54 }
 0x131   :  { %v472_v29 = vmax.f32 %v470_v8, %v471_v15  ;;  %v546_v30 = vadd.f32 %v1659_v51, %v465_v55  ;;  %v477_v32 = vmax.f32 %v475_v9, %v476_v20  ;;  %v483_v34 = vrot.slane %v482_v21, 2  ;;  %v1378_v55 = vld [vmem:[%s1875_s4 + $0x10] sm:$0xff]  }
 0x132   :  { %v490_v35 = vrot.slane %v489_v22, 2  ;;  %v496_v3 = vmax.f32 %v494_v33, %v495_v23  ;;  %v366_v31 = vrot.slane %v277_v44, %v1593_v11  ;;  %v501_v36 = vsel %vm388_vm3, %v358_v57, -inf  ;;  %1335 = vmatpush3.bf16.msra.mxu1 %v1378_v55 }
 0x133   :  { %v547_v56 = vadd.f32 %v1659_v51, %v472_v29  ;;  %v508_v37 = vsel %vm388_vm3, %v359_v19, -inf  ;;  %v478_v38 = vrot.slane %v477_v32, 1  ;;  %v484_v39 = vmax.f32 %v482_v21, %v483_v34  ;;  %1336 = vmatprep.subr.bf16.mxu1 %v1482_v0 }
 0x134   :  { %v491_v40 = vmax.f32 %v489_v22, %v490_v35  ;;  %v497_v41 = vrot.slane %v496_v3, 2  ;;  %v367_v43 = vcombine.high %v366_v31, %v366_v31  ;;  %v502_v46 = vrot.slane %v501_v36, 4 }
 0x135   :  { %v608_v42 = vrot.slane %v547_v56, 7  ;;  %v509_v47 = vrot.slane %v508_v37, 4  ;;  %v479_v48 = vmax.f32 %v477_v32, %v478_v38  ;;  %v485_v49 = vrot.slane %v484_v39, 1 }
 0x136   :  { %v492_v50 = vrot.slane %v491_v40, 1  ;;  %v498_v52 = vmax.f32 %v496_v3, %v497_v41  ;;  %v503_v53 = vmax.f32 %v501_v36, %v502_v46  ;;  %v515_v58 = vsel %vm388_vm3, %v366_v31, -inf }
 0x137   :  { %v609_v44 = vsel %vm586_vm4, %v608_v42, %v546_v30  ;;  %v510_v57 = vmax.f32 %v508_v37, %v509_v47  ;;  %v486_v59 = vmax.f32 %v484_v39, %v485_v49  ;;  %v548_v62 = vadd.f32 %v1659_v51, %v479_v48  ;;  %v1380_v48 = vld [vmem:[%s1875_s4 + $0x20] sm:$0xff]  }
 0x138   :  { %v493_v60 = vmax.f32 %v491_v40, %v492_v50  ;;  %v499_v61 = vrot.slane %v498_v52, 1  ;;  %v504_v63 = vrot.slane %v503_v53, 2  ;;  %v516_v2 = vrot.slane %v515_v58, 4 }
 0x139   :  { %v511_v1 = vrot.slane %v510_v57, 2  ;;  %v522_v4 = vsel %vm388_vm3, %v367_v43, -inf  ;;  %vm562_vm12 = vcmp.eq.s32.totalorder %v1682_v18, 9  ;;  %v549_v7 = vadd.f32 %v1659_v51, %v486_v59 }
 0x13a   :  { %v500_v6 = vmax.f32 %v498_v52, %v499_v61  ;;  %v550_v8 = vadd.f32 %v1659_v51, %v493_v60  ;;  %v610_v9 = vrot.slane %v548_v62, 6  ;;  %v505_v10 = vmax.f32 %v503_v53, %v504_v63 }
 0x13b   :  { %v512_v12 = vmax.f32 %v510_v57, %v511_v1  ;;  %v517_v33 = vmax.f32 %v515_v58, %v516_v2  ;;  %v523_v54 = vrot.slane %v522_v4, 4  ;;  %v544_v15 = vadd.f32 %v1659_v51, %v451_v27 }
 0x13c   :  { %v551_v19 = vadd.f32 %v1659_v51, %v500_v6  ;;  %v611_v20 = vsel %vm589_vm5, %v610_v9, %v609_v44  ;;  %v543_v21 = vadd.f32 %v1659_v51, %v1676_v16  ;;  %v506_v22 = vrot.slane %v505_v10, 1 }
 0x13d   :  { %v513_v23 = vrot.slane %v512_v12, 1  ;;  %v518_v29 = vrot.slane %v517_v33, 2  ;;  %v524_v30 = vmax.f32 %v522_v4, %v523_v54  ;;  %v612_v32 = vrot.slane %v549_v7, 5  ;;  %v1381_v4 = vld [vmem:[%s1875_s4 + $0x28] sm:$0xff]  }
 0x13e   :  { %v614_v34 = vrot.slane %v550_v8, 4  ;;  %v545_v35 = vadd.f32 %v1659_v51, %v458_v28  ;;  %v596_v27 = vsel %vm595_vm7, %v594_v24, %v1699_v45  ;;  %v507_v3 = vmax.f32 %v505_v10, %v506_v22  ;;  %v1379_v45 = vld [vmem:[%s1875_s4 + $0x18] sm:$0xff]  }
 0x13f   :  { %v514_v56 = vmax.f32 %v512_v12, %v513_v23  ;;  %v519_v31 = vmax.f32 %v517_v33, %v518_v29  ;;  %v525_v16 = vrot.slane %v524_v30, 2  ;;  %v599_v36 = vsel %vm598_vm8, %v597_v25, %v596_v27  ;;  %1337 = vmatpush3.bf16.msra.mxu1 %v1379_v45  ;;  %v1386_v27 = vld [vmem:[%s1877_s6 + $0x50] sm:$0xff]  }
 0x140   :  { %v603_v37 = vrot.slane %v543_v21, 1  ;;  %v606_v38 = vrot.slane %v545_v35, 7  ;;  %v613_v39 = vsel %vm592_vm6, %v612_v32, %v611_v20  ;;  %v552_v13 = vadd.f32 %v1659_v51, %v507_v3  ;;  %1338 = vmatprep.subr.bf16.mxu1 %v1482_v0  ;;  %v1383_v32 = vld [vmem:[%s1877_s6] sm:$0xff]   ;;  %v1385_v35 = vld [vmem:[%s1877_s6 + $0x8] sm:$0xff]   ;;  %v1387_v3 = vld [vmem:[%s1877_s6 + $0x10] sm:$0xff]  }
 0x141   :  { %v520_v28 = vrot.slane %v519_v31, 1  ;;  %v526_v40 = vmax.f32 %v524_v30, %v525_v16  ;;  %v553_v24 = vadd.f32 %v1659_v51, %v514_v56  ;;  %v616_v41 = vrot.slane %v551_v19, 3  ;;  %v1382_v30 = vld [vmem:[%s1877_s6 + $0x40] sm:$0xff]   ;;  %v1388_v56 = vld [vmem:[%s1877_s6 + $0x58] sm:$0xff]  }
 0x142   :  { %v602_v17 = vsel %vm601_vm9, %v600_v26, %v599_v36  ;;  %v607_v25 = vsel %vm586_vm4, %v606_v38, %v544_v15  ;;  %v615_v42 = vsel %vm595_vm7, %v614_v34, %v613_v39  ;;  %v618_v46 = vrot.slane %v552_v13, 2  ;;  %v1384_v34 = vld [vmem:[%s1877_s6 + $0x48] sm:$0xff]   ;;  %1285 = vmatprep.subr.bf16.mxu0 %v1382_v30  ;;  %v1390_v16 = vld [vmem:[%s1877_s6 + $0x60] sm:$0xff]   ;;  %v1394_v39 = vld [vmem:[%s1877_s6 + $0x70] sm:$0xff]  }
 0x143   :  { %v527_v43 = vrot.slane %v526_v40, 1  ;;  %v605_v47 = vsel %vm604_vm10, %v603_v37, %v602_v17  ;;  %v629_v14 = vsel %vm562_vm12, 0.0, %v607_v25  ;;  %v617_v26 = vsel %vm598_vm8, %v616_v41, %v615_v42  ;;  %1339 = vmatpush3.bf16.msra.mxu1 %v1380_v48  ;;  %1286 = vmatpush3.bf16.msra.mxu0 %v1383_v32  ;;  %v1391_v36 = vld [vmem:[%s1877_s6 + $0x20] sm:$0xff]   ;;  %v1392_v37 = vld [vmem:[%s1877_s6 + $0x68] sm:$0xff]  }
 0x144   :  { %v628_v49 = vsel %vm559_vm11, 0.0, %v605_v47  ;;  %v620_v50 = vrot.slane %v553_v24, 1  ;;  %v521_v52 = vmax.f32 %v519_v31, %v520_v28  ;;  %v619_v57 = vsel %vm601_vm9, %v618_v46, %v617_v26  ;;  %1340 = vmatprep.subr.bf16.mxu1 %v1482_v0  ;;  %1287 = vmatprep.subr.bf16.mxu0 %v1384_v34  ;;  %v1389_v31 = vld [vmem:[%s1877_s6 + $0x18] sm:$0xff]   ;;  %v1393_v38 = vld [vmem:[%s1877_s6 + $0x28] sm:$0xff]   ;;  %v1395_v28 = vld [vmem:[%s1877_s6 + $0x30] sm:$0xff]  }
 0x145   :  { %v528_v44 = vmax.f32 %v526_v40, %v527_v43  ;;  %v632_v53 = vpack.c.bf16 %v629_v14, %v628_v49  ;;  %v1239_v40 = vld [vmem:[#allocation2] ss:$0 sm:$0xff] }
 0x146   :  { %v621_v58 = vsel %vm604_vm10, %v620_v50, %v619_v57  ;;  %v554_v62 = vadd.f32 %v1659_v51, %v521_v52 }
 0x147   :  { %v555_v59 = vadd.f32 %v1659_v51, %v528_v44  ;;  %v654_v60 = vrot.slane %v632_v53, 1  ;;  %v637_v61 = vshll.u32 %v632_v53, 16  ;;  %v635_v63 = vshrl.u32 %v632_v53, 16  ;;  %1341 = vmatpush3.bf16.msra.mxu1 %v1381_v4  ;;  %1288 = vmatpush3.bf16.msra.mxu0 %v1385_v35 }
 0x148   :  { %v630_v8 = vsel %vm559_vm11, 0.0, %v621_v58  ;;  %1346 = vmatprep.subr.bf16.mxu1 %v1482_v0  ;;  %1289 = vmatprep.subr.bf16.mxu0 %v1386_v27 }
 0x149   :  { %656 = vrot.lane.b32.xlu1 %v654_v60, %s1480_s5  ;;  %v639_v1 = vrot.slane %v637_v61, 1  ;;  %v622_v2 = vrot.slane %v555_v59, 7 }
 0x14b   :  { %v640_v6 = vor.u32 %v639_v1, %v635_v63  ;;  %v623_v7 = vsel %vm586_vm4, %v622_v2, %v554_v62  ;;  %1290 = vmatpush3.bf16.msra.mxu0 %v1387_v3 }
 0x14c   :  { %v631_v9 = vsel %vm562_vm12, 0.0, %v623_v7  ;;  %1291 = vmatprep.subr.bf16.mxu0 %v1388_v56 }
 0x14d   :  { %648 = vrot.lane.b32.xlu0 %v640_v6, %s1485_s23  ;;  %v633_v51 = vpack.c.bf16 %v631_v9, %v630_v8 }
 0x14f   :  { %v655_v10 = vrot.slane %v633_v51, 1  ;;  %v644_v12 = vshll.u32 %v633_v51, 16  ;;  %v642_v33 = vshrl.u32 %v633_v51, 16  ;;  %1292 = vmatpush3.bf16.msra.mxu0 %v1389_v31 }
 0x150   :  { %1293 = vmatprep.subr.bf16.mxu0 %v1390_v16 }
 0x151   :  { %658 = vrot.lane.b32.xlu1 %v655_v10, %s1480_s5  ;;  %v646_v54 = vrot.slane %v644_v12, 1 }
 0x153   :  { %v647_v55 = vor.u32 %v646_v54, %v642_v33  ;;  %1294 = vmatpush3.bf16.msra.mxu0 %v1391_v36 }
 0x154   :  { %1295 = vmatprep.subr.bf16.mxu0 %v1392_v37 }
 0x155   :  { %650 = vrot.lane.b32.xlu0 %v647_v55, %s1485_s23 }
 0x157   :  { %1296 = vmatpush3.bf16.msra.mxu0 %v1393_v38 }
 0x158   :  { %1297 = vmatprep.subr.bf16.mxu0 %v1394_v39 }
 0x15b   :  { %1298 = vmatpush3.bf16.msra.mxu0 %v1395_v28 }
 0x1bb   :  { %v657_v15 = vpop.permute.xlu1 %656 }
 0x1bf   :  { %v649_v5 = vpop.permute.xlu0 %648 }
 0x1c0   :  { %v662_v18 = vsel %vm660_vm13, %v632_v53, %v649_v5 }
 0x1c1   :  { %v667_v22 = vsel %vm665_vm14, %v662_v18, %v657_v15 }
 0x1c3   :  { %v659_v20 = vpop.permute.xlu1 %658 }
 0x1c7   :  { %v651_v19 = vpop.permute.xlu0 %650 }
 0x1c8   :  { %v664_v21 = vsel %vm660_vm13, %v633_v51, %v651_v19 }
 0x1c9   :  { %v669_v23 = vsel %vm665_vm14, %v664_v21, %v659_v20 }
 0x1ca   :  { %v1240_v29 = vcombine.low %v667_v22, %v669_v23 }
 0x1cc   :  { %1343 = vmatmul.mubr.msk.bf16.vlgmr.msra.gmra.mrb[0].mxu1 %vm730_vm15, %v1240_v29 }
 0x1cd   :  { %1362 = vmatprep.mubr.msk.bf16.mxu1 %vm1483_vm0, %v1482_v0  ;;  %vm821_vm0 = vcmask 517120  }
 0x29f   :  { %v768_v13 = vpop.f32.mrb[0].mxu1 }
 0x2a0   :  { %v769_v24 = vadd.f32 %v1239_v40, %v768_v13  ;;  %v1344_v45 = vpop.f32.mrb[1].mxu1 }
 0x2a1   :  { %v771_v41 = vpop.f32.mrb[2].mxu1 }
 0x2a2   :  { %v775_v17 = vmax.f32 %v769_v24, 0.0  ;;  %v772_v25 = vadd.f32 %v1239_v40, %v771_v41  ;;  %v1345_v42 = vpop.f32.mrb[3].mxu1  ;;  %v1396_v40 = vld [vmem:[%s1877_s6 + $0x78] sm:$0xff]  }
 0x2a3   :  { %1299 = vmatprep.subr.bf16.mxu0 %v1396_v40 }
 0x2a4   :  { %v779_v43 = vcombine.high %v775_v17, %v775_v17  ;;  %v786_v46 = vrot.slane %v775_v17, %v1593_v11  ;;  %v776_v47 = vmax.f32 %v772_v25, 0.0  ;;  %v1397_v25 = vld [vmem:[%s1877_s6 + $0x38] sm:$0xff]  }
 0x2a5   :  { %1300 = vmatpush3.bf16.msra.mxu0 %v1397_v25 }
 0x2a6   :  { %v793_v48 = vrot.slane %v779_v43, %v1593_v11  ;;  %v794_v49 = vcombine.high %v786_v46, %v786_v46  ;;  %v822_v14 = vsel %vm821_vm0, %v786_v46, -inf  ;;  %v796_v26 = vcombine.high %v776_v47, %v776_v47 }
 0x2a7   :  { %v823_v50 = vrot.slane %v822_v14, 4  ;;  %v803_v52 = vrot.slane %v776_v47, %v1593_v11 }
 0x2a8   :  { %v795_v44 = vcombine.high %v793_v48, %v793_v48  ;;  %v829_v53 = vsel %vm821_vm0, %v794_v49, -inf  ;;  %v836_v57 = vsel %vm821_vm0, %v793_v48, -inf  ;;  %v810_v58 = vrot.slane %v796_v26, %v1593_v11  ;;  %v1398_v26 = vld [vmem:[#allocation5] sm:$0xff]  }
 0x2a9   :  { %v824_v59 = vmax.f32 %v822_v14, %v823_v50  ;;  %v830_v60 = vrot.slane %v829_v53, 4  ;;  %v837_v61 = vrot.slane %v836_v57, 4  ;;  %v811_v62 = vcombine.high %v803_v52, %v803_v52  ;;  %1347 = vmatpush3.bf16.msra.mxu1 %v1398_v26 }
 0x2aa   :  { %v843_v63 = vsel %vm821_vm0, %v795_v44, -inf  ;;  %v812_v1 = vcombine.high %v810_v58, %v810_v58  ;;  %v850_v2 = vsel %vm821_vm0, %v803_v52, -inf  ;;  %v864_v4 = vsel %vm821_vm0, %v810_v58, -inf  ;;  %1348 = vmatprep.subr.bf16.mxu1 %v1482_v0 }
 0x2ab   :  { %v825_v6 = vrot.slane %v824_v59, 2  ;;  %v831_v7 = vmax.f32 %v829_v53, %v830_v60  ;;  %v838_v8 = vmax.f32 %v836_v57, %v837_v61  ;;  %v844_v9 = vrot.slane %v843_v63, 4 }
 0x2ac   :  { %v851_v51 = vrot.slane %v850_v2, 4  ;;  %v857_v10 = vsel %vm821_vm0, %v811_v62, -inf  ;;  %v865_v12 = vrot.slane %v864_v4, 4  ;;  %v871_v11 = vsel %vm821_vm0, %v812_v1, -inf }
 0x2ad   :  { %v826_v33 = vmax.f32 %v824_v59, %v825_v6  ;;  %v832_v54 = vrot.slane %v831_v7, 2  ;;  %v839_v55 = vrot.slane %v838_v8, 2  ;;  %v845_v5 = vmax.f32 %v843_v63, %v844_v9  ;;  %v1399_v59 = vld [vmem:[#allocation5 + $0x8] sm:$0xff]  }
 0x2ae   :  { %v852_v15 = vmax.f32 %v850_v2, %v851_v51  ;;  %v858_v18 = vrot.slane %v857_v10, 4  ;;  %v866_v19 = vmax.f32 %v864_v4, %v865_v12  ;;  %v872_v20 = vrot.slane %v871_v11, 4  ;;  %1349 = vmatpush3.bf16.msra.mxu1 %v1399_v59 }
 0x2af   :  { %v827_v21 = vrot.slane %v826_v33, 1  ;;  %v840_v22 = vmax.f32 %v838_v8, %v839_v55  ;;  %v833_v23 = vmax.f32 %v831_v7, %v832_v54  ;;  %v846_v29 = vrot.slane %v845_v5, 2  ;;  %1350 = vmatprep.subr.bf16.mxu1 %v1482_v0  ;;  %v1401_v55 = vld [vmem:[#allocation5 + $0x18] sm:$0xff]  }
 0x2b0   :  { %v853_v30 = vrot.slane %v852_v15, 2  ;;  %v859_v32 = vmax.f32 %v857_v10, %v858_v18  ;;  %v867_v34 = vrot.slane %v866_v19, 2  ;;  %v873_v35 = vmax.f32 %v871_v11, %v872_v20  ;;  %v1400_v10 = vld [vmem:[#allocation5 + $0x10] sm:$0xff]  }
 0x2b1   :  { %v828_v27 = vmax.f32 %v826_v33, %v827_v21  ;;  %v841_v3 = vrot.slane %v840_v22, 1  ;;  %v834_v56 = vrot.slane %v833_v23, 1  ;;  %v847_v31 = vmax.f32 %v845_v5, %v846_v29  ;;  %v1402_v5 = vld [vmem:[#allocation5 + $0x20] sm:$0xff]   ;;  %v1404_v29 = vld [vmem:[#allocation5 + $0x30] sm:$0xff]  }
 0x2b2   :  { %v854_v16 = vmax.f32 %v852_v15, %v853_v30  ;;  %v860_v36 = vrot.slane %v859_v32, 2  ;;  %v868_v37 = vmax.f32 %v866_v19, %v867_v34  ;;  %v874_v38 = vrot.slane %v873_v35, 2  ;;  %1351 = vmatpush3.bf16.msra.mxu1 %v1400_v10  ;;  %v1403_v15 = vld [vmem:[#allocation5 + $0x28] sm:$0xff]   ;;  %v1405_v30 = vld [vmem:[#allocation5 + $0x38] sm:$0xff]  }
 0x2b3   :  { %v835_v39 = vmax.f32 %v833_v23, %v834_v56  ;;  %v848_v28 = vrot.slane %v847_v31, 1  ;;  %v842_v13 = vmax.f32 %v840_v22, %v841_v3  ;;  %v878_v42 = vpack.c.bf16 %v828_v27, %v828_v27  ;;  %1352 = vmatprep.subr.bf16.mxu1 %v1482_v0  ;;  %v1248_v34 = vld [vmem:[%s1878_s7] ss:$0 sm:$0xff]  ;;  %s1450_s7 = scalar_lea.vmem %s1218_s11, 32 }
 0x2b4   :  { %v855_v24 = vrot.slane %v854_v16, 1  ;;  %v869_v45 = vrot.slane %v868_v37, 1  ;;  %v861_v41 = vmax.f32 %v859_v32, %v860_v36  ;;  %v875_v17 = vmax.f32 %v873_v35, %v874_v38  ;;  %p1451_p2 = scmp.ne.s32.totalorder %s1218_s11, %s1450_s7  ;;  %p1456_p4 = scmp.lt.s32.totalorder %s1450_s7, %s1450_s7 }
 0x2b5   :  { %v849_v43 = vmax.f32 %v847_v31, %v848_v28  ;;  %v880_v46 = vpack.c.bf16 %v842_v13, %v842_v13  ;;  %v879_v50 = vpack.c.bf16 %v835_v39, %v835_v39  ;;  %v888_v60 = vunpack.c.l.b16 %v878_v42 }
 0x2b6   :  { %v856_v47 = vmax.f32 %v854_v16, %v855_v24  ;;  %v862_v48 = vrot.slane %v861_v41, 1  ;;  %v876_v49 = vrot.slane %v875_v17, 1  ;;  %v870_v14 = vmax.f32 %v868_v37, %v869_v45  ;;  %1353 = vmatpush3.bf16.msra.mxu1 %v1401_v55  ;;  %v1265_v37 = vld [vmem:[%s1880_s9] ss:$0 sm:$0xff]  ;;  %p1457_p5 = por %p1456_p4, %p1455_p3 }
 0x2b7   :  { %v881_v52 = vpack.c.bf16 %v849_v43, %v849_v43  ;;  %v902_v61 = vunpack.c.l.b16 %v880_v46  ;;  %v894_v4 = vunpack.c.l.b16 %v879_v50  ;;  %1354 = vmatprep.subr.bf16.mxu1 %v1482_v0 }
 0x2b8   :  { %v882_v44 = vpack.c.bf16 %v856_v47, %v856_v47  ;;  %v863_v53 = vmax.f32 %v861_v41, %v862_v48  ;;  %v877_v57 = vmax.f32 %v875_v17, %v876_v49  ;;  %v884_v58 = vpack.c.bf16 %v870_v14, %v870_v14  ;;  %p1458_p6 = pnand %p1457_p5, %p1451_p2 }
 0x2b9   :  { %v908_v6 = vunpack.c.l.b16 %v881_v52 }
 0x2ba   :  { %v883_v62 = vpack.c.bf16 %v863_v53, %v863_v53  ;;  %v885_v63 = vpack.c.bf16 %v877_v57, %v877_v57  ;;  %v889_v1 = vunpack.c.l.b16 %v882_v44  ;;  %v903_v2 = vunpack.c.l.b16 %v884_v58  ;;  %1355 = vmatpush3.bf16.msra.mxu1 %v1402_v5 }
 0x2bb   :  { %1356 = vmatprep.subr.bf16.mxu1 %v1482_v0 }
 0x2bc   :  { %v895_v7 = vunpack.c.l.b16 %v883_v62  ;;  %v909_v8 = vunpack.c.l.b16 %v885_v63  ;;  %v890_v9 = vsel %vm586_vm4, %v889_v1, %v888_v60  ;;  %v904_v51 = vsel %vm586_vm4, %v903_v2, %v902_v61 }
 0x2bd   :  { %v905_v18 = vpack.c.b16 %v904_v51, %v904_v51  ;;  %v891_v19 = vpack.c.b16 %v890_v9, %v890_v9 }
 0x2be   :  { %v896_v12 = vsel %vm586_vm4, %v895_v7, %v894_v4  ;;  %v910_v11 = vsel %vm586_vm4, %v909_v8, %v908_v6  ;;  %1357 = vmatpush3.bf16.msra.mxu1 %v1403_v15 }
 0x2bf   :  { %v897_v33 = vpack.c.b16 %v896_v12, %v896_v12  ;;  %v911_v54 = vpack.c.b16 %v910_v11, %v910_v11  ;;  %1358 = vmatprep.subr.bf16.mxu1 %v1482_v0 }
 0x2c1   :  { %898 = vrot.lane.b32.xlu1 %v897_v33, %s1480_s5  ;;  %912 = vrot.lane.b32.xlu0 %v911_v54, %s1480_s5 }
 0x2c2   :  { %1359 = vmatpush3.bf16.msra.mxu1 %v1404_v29 }
 0x2c3   :  { %1360 = vmatprep.subr.bf16.mxu1 %v1482_v0 }
 0x2c6   :  { %1361 = vmatpush3.bf16.msra.mxu1 %v1405_v30 }
 0x333   :  { %v899_v20 = vpop.permute.xlu1 %898  ;;  %v913_v21 = vpop.permute.xlu0 %912 }
 0x334   :  { %v920_v22 = vsel %vm665_vm14, %v905_v18, %v913_v21  ;;  %v916_v23 = vsel %vm665_vm14, %v891_v19, %v899_v20 }
 0x335   :  { %1089 = vmatprep.mubr.bf16.mxu0 %v920_v22 }
 0x336   :  { %1090 = vmatmul.mubr.bf16.vlgmr.msra.gmra.mrb[12].mxu0 %v916_v23 }
 0x409   :  { %v1301_v32 = vpop.f32.mrb[12].mxu0 }
 0x40a   :  { %v1302_v35 = vpop.f32.mrb[13].mxu0 }
 0x40b   :  { %v1303_v27 = vadd.f32 %v1302_v35, %v1301_v32  ;;  %v1304_v3 = vpop.f32.mrb[14].mxu0 }
 0x40c   :  { %v1305_v56 = vpop.f32.mrb[15].mxu0 }
 0x40d   :  { %v1092_v31 = vadd.f32 %v1303_v27, %v1248_v34 }
 0x40f   :  { %v1097_v16 = vmax.f32 %v1092_v31, 0.0 }
 0x411   :  { %v1098_v36 = vpack.c.bf16 %v1097_v16, %v1097_v16 }
 0x413   :  { %1363 = vmatmul.mubr.bf16.vlgmr.msra.gmra.mrb[4].mxu1 %v1098_v36 }
 0x4e6   :  { %v1204_v0 = vpop.f32.mrb[4].mxu1 }
 0x4e7   :  { %v1205_v38 = vadd.f32 %v1265_v37, %v1204_v0  ;;  %v1364_v39 = vpop.f32.mrb[5].mxu1 }
 0x4e8   :  { %v1207_v28 = vpop.f32.mrb[6].mxu1 }
 0x4e9   :  { %1210 = vst [vmem:[#allocation7] sm:$0x3] %v1205_v38  ;;  %v1365_v40 = vpop.f32.mrb[7].mxu1 }
 0x4ea   :  { %1461 = shalt.err (!%p1458_p6)
}
 0x4eb   :  { %s1462_s9 = scalar_lea.hbm %s1881_s10, 32 }
 0x4ec   :  { %p1463_p7 = scmp.ne.s32.totalorder %s1881_s10, %s1462_s9  ;;  %p1466_p8 = scmp.lt.u32.totalorder %s1462_s9, %s1881_s10 }
 0x4ee   :  { %p1468_p9 = pnand %p1466_p8, %p1463_p7 }
 0x4f0   :  { %1471 = shalt.err (!%p1468_p9)
}
 0x4f1   :  { %1220 = dma.vmem_to_hbm [thread:$0]  %s1218_s11, 32, %s1881_s10, [#allocation4]  }
 0x4f2   :  { %1476 = dma.done.wait [#allocation4], 32  }
 0x4f3   :  { %1477 = vsyncadd [#allocation4], 4294967264 }
 0x4f4   :  { %1224 = vsyncpa [#allocation3], 1 }
 0x4f5   :  { %1225 = vsyncpa [#allocation6], 1 }
 0x4f6   :  { %1226 = vsyncpa [#allocation4], 1 }

</bundles_post_ra>
